<compile_context>
chip_gen: v7x
topology: tpu7x:2x2x1
jax: 0.10.0
libtpu: 0.0.40
codegen_flags: <defaults>
</compile_context>

<pallas_src>
import functools
import math

import jax
import jax.numpy as jnp
from jax.experimental import pallas as pl
from jax.experimental.pallas import tpu as pltpu

# ---------------- small shapes consistent with the module's usage ----------------
B = 2             # batch
N = 8             # tokens per batch element
INPUT_DIM = 32
HIDDEN_DIM = 64
OUTPUT_DIM = 32
NUM_LAYERS = 3
ACTIVATION = "relu"        # 'relu' | 'leaky_relu' | anything else => identity

LANE = 128                 # pad every feature dim to full lane width
SUBLANE = 8


def _round_up(x, m):
    return ((x + m - 1) // m) * m


def _mlp_fused_kernel(x_ref, w_ref, b_ref, o_ref, *, num_layers, activation):
    """All num_layers Linear(+activation) layers in one kernel invocation.

    x_ref : (MPAD, DPAD)            zero-padded, batch-flattened input
    w_ref : (L, DPAD, DPAD)         per-layer (in, out) weights, zero-padded
    b_ref : (L, 1, DPAD)            per-layer biases, zero-padded
    o_ref : (MPAD, DPAD)            padded output slab (wrapper slices/reshapes)
    """
    h = x_ref[...].astype(jnp.float32)
    for i in range(num_layers):          # static unroll; intermediates never leave VMEM
        h = jnp.dot(h, w_ref[i], preferred_element_type=jnp.float32) + b_ref[i]
        if i < num_layers - 1:
            if activation == "relu":
                h = jnp.maximum(h, 0.0)
            elif activation == "leaky_relu":
                h = jnp.where(h > 0.0, h, 0.1 * h)
            # else: no activation (matches the PyTorch module's fallthrough)
    o_ref[...] = h.astype(o_ref.dtype)


def mlp_forward(x, weights, biases, activation=ACTIVATION):
    """Pallas equivalent of MLP.forward.

    x       : (B, N, input_dim)
    weights : list of PyTorch-convention (out_i, in_i) matrices
    biases  : list of (out_i,) vectors
    returns : (B, N, output_dim)
    """
    num_layers = len(weights)
    dims = [weights[0].shape[1]] + [w.shape[0] for w in weights]
    out_dim = dims[-1]

    b, n, _ = x.shape
    m = b * n
    mpad = _round_up(m, SUBLANE)
    dpad = _round_up(max(dims), LANE)

    # --- pack inputs / weights into lane-dense zero-padded slabs (host-side) ---
    x2 = x.reshape(m, dims[0]).astype(jnp.float32)
    x_pad = jnp.zeros((mpad, dpad), jnp.float32).at[:m, :dims[0]].set(x2)

    w_stack = jnp.zeros((num_layers, dpad, dpad), jnp.float32)
    b_stack = jnp.zeros((num_layers, 1, dpad), jnp.float32)
    for i, (w, bb) in enumerate(zip(weights, biases)):
        # nn.Linear stores (out, in) and computes x @ W.T  ->  transpose to (in, out).
        w_stack = w_stack.at[i, : w.shape[1], : w.shape[0]].set(
            w.T.astype(jnp.float32))
        b_stack = b_stack.at[i, 0, : bb.shape[0]].set(bb.astype(jnp.float32))
    # Zero-padded rows/cols guarantee padded activation columns stay exactly zero
    # through every layer, so the padded math equals the unpadded math.

    kernel = functools.partial(
        _mlp_fused_kernel, num_layers=num_layers, activation=activation)

    out_pad = pl.pallas_call(
        kernel,
        out_shape=jax.ShapeDtypeStruct((mpad, dpad), jnp.float32),
        grid_spec=pltpu.PrefetchScalarGridSpec(
            num_scalar_prefetch=0,
            grid=(1,),                                   # single step: whole problem fits VMEM
            in_specs=[
                pl.BlockSpec((mpad, dpad), lambda i: (0, 0)),
                pl.BlockSpec((num_layers, dpad, dpad), lambda i: (0, 0, 0)),
                pl.BlockSpec((num_layers, 1, dpad), lambda i: (0, 0, 0)),
            ],
            out_specs=pl.BlockSpec((mpad, dpad), lambda i: (0, 0)),
        ),
        compiler_params=pltpu.CompilerParams(
            dimension_semantics=("arbitrary",)),
    )(x_pad, w_stack, b_stack)

    return out_pad[:m, :out_dim].reshape(b, n, out_dim)


# ----------------------------- pure-JAX reference ------------------------------
def mlp_reference(x, weights, biases, activation=ACTIVATION):
    h = x
    num_layers = len(weights)
    for i, (w, bb) in enumerate(zip(weights, biases)):
        h = h @ w.T + bb
        if i < num_layers - 1:
            if activation == "relu":
                h = jnp.maximum(h, 0.0)
            elif activation == "leaky_relu":
                h = jnp.where(h > 0.0, h, 0.1 * h)
    return h


def init_mlp_params(key, input_dim, hidden_dim, output_dim, num_layers):
    """Deterministic xavier-ish init, PyTorch nn.Linear (out, in) convention."""
    h = [hidden_dim] * (num_layers - 1)
    in_dims = [input_dim] + h
    out_dims = h + [output_dim]
    keys = jax.random.split(key, num_layers)
    weights, biases = [], []
    for k, din, dout in zip(keys, in_dims, out_dims):
        limit = math.sqrt(6.0 / (din + dout))
        weights.append(jax.random.uniform(k, (dout, din), jnp.float32, -limit, limit))
        biases.append(jnp.zeros((dout,), jnp.float32))
    return weights, biases


if __name__ == "__main__":
    key = jax.random.PRNGKey(0)
    k_x, k_p = jax.random.split(key)

    x = jax.random.normal(k_x, (B, N, INPUT_DIM), jnp.float32)
    weights, biases = init_mlp_params(k_p, INPUT_DIM, HIDDEN_DIM, OUTPUT_DIM, NUM_LAYERS)

    out = mlp_forward(x, weights, biases, ACTIVATION)
    out = jax.block_until_ready(out)

    ref = mlp_reference(x, weights, biases, ACTIVATION)

    assert out.shape == (B, N, OUTPUT_DIM)
    assert bool(jnp.all(jnp.isfinite(out)))
    # loose tolerance: MXU default-precision f32 matmul vs XLA reference
    assert bool(jnp.allclose(out, ref, atol=1e-2, rtol=1e-2)), (
        float(jnp.max(jnp.abs(out - ref))))

    print("KERNEL_OK")
</pallas_src>

<mosaic_0001>
module attributes {stable_mosaic.version = 11 : i64} {
  func.func @_mlp_fused_kernel(%arg0: i32, %arg1: memref<16x128xf32, #tpu.memory_space<vmem>>, %arg2: memref<3x128x128xf32, #tpu.memory_space<vmem>>, %arg3: memref<3x1x128xf32, #tpu.memory_space<vmem>>, %arg4: memref<16x128xf32, #tpu.memory_space<vmem>>) attributes {dimension_semantics = [#tpu.dimension_semantics<arbitrary>], iteration_bounds = array<i64: 1>, scalar_prefetch = 0 : i64, scratch_operands = 0 : i64, tpu.core_type = #tpu.core_type<tc>, window_params = [{pipeline_mode = #tpu.pipeline_mode<synchronous>, transform_indices = @transform_0, window_bounds = array<i64: 16, 128>}, {pipeline_mode = #tpu.pipeline_mode<synchronous>, transform_indices = @transform_1, window_bounds = array<i64: 3, 128, 128>}, {pipeline_mode = #tpu.pipeline_mode<synchronous>, transform_indices = @transform_2, window_bounds = array<i64: 3, 1, 128>}, {pipeline_mode = #tpu.pipeline_mode<synchronous>, transform_indices = @transform_3, window_bounds = array<i64: 16, 128>}]} {
    %c0 = arith.constant 0 : index
    %c0_0 = arith.constant 0 : index
    %0 = vector.load %arg1[%c0, %c0_0] : memref<16x128xf32, #tpu.memory_space<vmem>>, vector<16x128xf32>
    %c0_1 = arith.constant 0 : index
    %c0_2 = arith.constant 0 : index
    %c0_3 = arith.constant 0 : index
    %1 = vector.load %arg2[%c0_1, %c0_2, %c0_3] : memref<3x128x128xf32, #tpu.memory_space<vmem>>, vector<1x128x128xf32>
    %2 = vector.shape_cast %1 : vector<1x128x128xf32> to vector<128x128xf32>
    %cst = arith.constant dense<0.000000e+00> : vector<16x128xf32>
    %3 = tpu.matmul %0, %2, %cst {dimension_numbers = #tpu.dot_dimension_numbers<[1], [0], [0], [1], [0, 0, 1, 1], [], []>} : vector<16x128xf32>, vector<128x128xf32>, vector<16x128xf32> -> vector<16x128xf32>
    %c0_4 = arith.constant 0 : index
    %c0_5 = arith.constant 0 : index
    %c0_6 = arith.constant 0 : index
    %4 = vector.load %arg3[%c0_4, %c0_5, %c0_6] : memref<3x1x128xf32, #tpu.memory_space<vmem>>, vector<1x1x128xf32>
    %5 = vector.shape_cast %4 : vector<1x1x128xf32> to vector<1x128xf32>
    %6 = vector.broadcast %5 : vector<1x128xf32> to vector<16x128xf32>
    %7 = arith.addf %3, %6 : vector<16x128xf32>
    %cst_7 = arith.constant 0.000000e+00 : f32
    %8 = vector.broadcast %cst_7 : f32 to vector<16x128xf32>
    %9 = arith.maximumf %7, %8 : vector<16x128xf32>
    %c1 = arith.constant 1 : index
    %c0_8 = arith.constant 0 : index
    %c0_9 = arith.constant 0 : index
    %10 = vector.load %arg2[%c1, %c0_8, %c0_9] : memref<3x128x128xf32, #tpu.memory_space<vmem>>, vector<1x128x128xf32>
    %11 = vector.shape_cast %10 : vector<1x128x128xf32> to vector<128x128xf32>
    %cst_10 = arith.constant dense<0.000000e+00> : vector<16x128xf32>
    %12 = tpu.matmul %9, %11, %cst_10 {dimension_numbers = #tpu.dot_dimension_numbers<[1], [0], [0], [1], [0, 0, 1, 1], [], []>} : vector<16x128xf32>, vector<128x128xf32>, vector<16x128xf32> -> vector<16x128xf32>
    %c1_11 = arith.constant 1 : index
    %c0_12 = arith.constant 0 : index
    %c0_13 = arith.constant 0 : index
    %13 = vector.load %arg3[%c1_11, %c0_12, %c0_13] : memref<3x1x128xf32, #tpu.memory_space<vmem>>, vector<1x1x128xf32>
    %14 = vector.shape_cast %13 : vector<1x1x128xf32> to vector<1x128xf32>
    %15 = vector.broadcast %14 : vector<1x128xf32> to vector<16x128xf32>
    %16 = arith.addf %12, %15 : vector<16x128xf32>
    %cst_14 = arith.constant 0.000000e+00 : f32
    %17 = vector.broadcast %cst_14 : f32 to vector<16x128xf32>
    %18 = arith.maximumf %16, %17 : vector<16x128xf32>
    %c2 = arith.constant 2 : index
    %c0_15 = arith.constant 0 : index
    %c0_16 = arith.constant 0 : index
    %19 = vector.load %arg2[%c2, %c0_15, %c0_16] : memref<3x128x128xf32, #tpu.memory_space<vmem>>, vector<1x128x128xf32>
    %20 = vector.shape_cast %19 : vector<1x128x128xf32> to vector<128x128xf32>
    %cst_17 = arith.constant dense<0.000000e+00> : vector<16x128xf32>
    %21 = tpu.matmul %18, %20, %cst_17 {dimension_numbers = #tpu.dot_dimension_numbers<[1], [0], [0], [1], [0, 0, 1, 1], [], []>} : vector<16x128xf32>, vector<128x128xf32>, vector<16x128xf32> -> vector<16x128xf32>
    %c2_18 = arith.constant 2 : index
    %c0_19 = arith.constant 0 : index
    %c0_20 = arith.constant 0 : index
    %22 = vector.load %arg3[%c2_18, %c0_19, %c0_20] : memref<3x1x128xf32, #tpu.memory_space<vmem>>, vector<1x1x128xf32>
    %23 = vector.shape_cast %22 : vector<1x1x128xf32> to vector<1x128xf32>
    %24 = vector.broadcast %23 : vector<1x128xf32> to vector<16x128xf32>
    %25 = arith.addf %21, %24 : vector<16x128xf32>
    %c0_21 = arith.constant 0 : index
    %c0_22 = arith.constant 0 : index
    %26 = vector.load %arg4[%c0_21, %c0_22] : memref<16x128xf32, #tpu.memory_space<vmem>>, vector<16x128xf32>
    tpu.vector_store %arg4[%c0_21, %c0_22], %25 {strides = array<i32>} : memref<16x128xf32, #tpu.memory_space<vmem>>, vector<16x128xf32>,
    return
  }
  func.func @transform_0(%arg0: i32) -> (i32, i32) {
    %c0_i32 = arith.constant 0 : i32
    %c0_i32_0 = arith.constant 0 : i32
    %c0_i32_1 = arith.constant 0 : i32
    return %c0_i32, %c0_i32_0 : i32, i32
  }
  func.func @transform_1(%arg0: i32) -> (i32, i32, i32) {
    %c0_i32 = arith.constant 0 : i32
    %c0_i32_0 = arith.constant 0 : i32
    %c0_i32_1 = arith.constant 0 : i32
    %c0_i32_2 = arith.constant 0 : i32
    return %c0_i32, %c0_i32_0, %c0_i32_1 : i32, i32, i32
  }
  func.func @transform_2(%arg0: i32) -> (i32, i32, i32) {
    %c0_i32 = arith.constant 0 : i32
    %c0_i32_0 = arith.constant 0 : i32
    %c0_i32_1 = arith.constant 0 : i32
    %c0_i32_2 = arith.constant 0 : i32
    return %c0_i32, %c0_i32_0, %c0_i32_1 : i32, i32, i32
  }
  func.func @transform_3(%arg0: i32) -> (i32, i32) {
    %c0_i32 = arith.constant 0 : i32
    %c0_i32_0 = arith.constant 0 : i32
    %c0_i32_1 = arith.constant 0 : i32
    return %c0_i32, %c0_i32_0 : i32, i32
  }
}

</mosaic_0001>

<bundles_post_ra>
// kernel: tpu_custom_call.1
= control target key start
LH: loop header
LB: loop body
LE: loop exit
PB: predicated region body
PF: predicated region fallthrough
CT: control target
= control target key end

     0   :  { %8 = vsyncpa [#allocation3], 0  ;;  %s783_s0 = inlined_call_operand.hbm [shape: f32[16,128], index: 0, kind: input, shape index: {}]   ;;  %s784_s1 = inlined_call_operand.hbm [shape: f32[3,128,128], index: 1, kind: input, shape index: {}]   ;;  %s785_s2 = inlined_call_operand.vmem [shape: f32[3,1,128], index: 2, kind: input, shape index: {}]   ;;  %s786_s3 = inlined_call_operand.hbm [shape: f32[16,128], index: 3, kind: output, shape index: {}]  }
   0x1   :  { %9 = vsyncpa [#allocation6], 0 }
   0x2   :  { %10 = vsyncpa [#allocation4], 0  ;;  %s704_s12 = smov [#allocation2]   ;;  %s632_s16 = scalar_lea.hbm %s783_s0, 256 }
   0x3   :  { %s16_s13 = sshll.u32 %s704_s12, 4  ;;  %p633_p0 = scmp.ne.s32.totalorder %s783_s0, %s632_s16  ;;  %s17_s13 = int_to_ptr.vmem [resolvable:$true] %s16_s13 }
   0x4   :  { %p636_p1 = scmp.lt.u32.totalorder %s632_s16, %s783_s0 }
   0x6   :  { %p638_p2 = pnand %p636_p1, %p633_p0 }
   0x8   :  { %641 = shalt.err (!%p638_p2)
}
   0x9   :  { %s642_s21 = scalar_lea.vmem %s17_s13, 256  ;;  %p647_p4 = scmp.lt.s32.totalorder %s17_s13, %s17_s13 }
   0xa   :  { %p643_p3 = scmp.ne.s32.totalorder %s17_s13, %s642_s21  ;;  %p648_p5 = scmp.lt.s32.totalorder %s642_s21, %s642_s21 }
   0xc   :  { %p649_p6 = por %p648_p5, %p647_p4 }
   0xe   :  { %p650_p7 = pnand %p649_p6, %p643_p3 }
  0x10   :  { %653 = shalt.err (!%p650_p7)
}
  0x11   :  { %s705_s22 = smov 128   ;;  %s706_s23 = smov 8  }
  0x12   :  { %22 = dma.hbm_to_vmem [thread:$0]  %s783_s0, 256, %s17_s13, [#allocation3], %s705_s22, %s705_s22, %s706_s23  }
  0x13   :  { %s707_s26 = smov [#allocation5]   ;;  %s654_s30 = scalar_lea.hbm %s784_s1, 6144 }
  0x14   :  { %s28_s27 = sshll.u32 %s707_s26, 4  ;;  %p655_p8 = scmp.ne.s32.totalorder %s784_s1, %s654_s30  ;;  %s29_s27 = int_to_ptr.vmem [resolvable:$true] %s28_s27 }
  0x15   :  { %p658_p9 = scmp.lt.u32.totalorder %s654_s30, %s784_s1 }
  0x17   :  { %p660_p10 = pnand %p658_p9, %p655_p8 }
  0x19   :  { %663 = shalt.err (!%p660_p10)
}
  0x1a   :  { %s664_s8 = scalar_lea.vmem %s29_s27, 6144  ;;  %p669_p12 = scmp.lt.s32.totalorder %s29_s27, %s29_s27 }
  0x1b   :  { %p665_p11 = scmp.ne.s32.totalorder %s29_s27, %s664_s8  ;;  %p670_p13 = scmp.lt.s32.totalorder %s664_s8, %s664_s8 }
  0x1d   :  { %p671_p0 = por %p670_p13, %p669_p12 }
  0x1f   :  { %p672_p1 = pnand %p671_p0, %p665_p11 }
  0x21   :  { %675 = shalt.err (!%p672_p1)
}
  0x22   :  { %34 = dma.hbm_to_vmem [thread:$0]  %s784_s1, 6144, %s29_s27, [#allocation6], %s705_s22, %s705_s22, %s706_s23  }
  0x23   :  { %698 = dma.done.wait [#allocation3], 256  }
  0x24   :  { %699 = vsyncadd [#allocation3], 4294967040 }
  0x25   :  { %700 = dma.done.wait [#allocation6], 6144  }
  0x26   :  { %701 = vsyncadd [#allocation6], 4294961152  ;;  %v45_v0 = vld [vmem:[#allocation5] sm:$0xff]  ;;  %v46_v1 = vld [vmem:[#allocation5 + $0x8] sm:$0xff]  ;;  %s708_s15 = smov [#allocation7]  }
  0x27   :  { %v47_v2 = vld [vmem:[#allocation5 + $0x10] sm:$0xff]  ;;  %v531_v3 = vpack.c.bf16 %v46_v1, %v45_v0  ;;  %v48_v4 = vld [vmem:[#allocation5 + $0x18] sm:$0xff]  ;;  %v49_v6 = vld [vmem:[#allocation5 + $0x20] sm:$0xff]  ;;  %s354_s16 = sshll.u32 %s708_s15, 4  ;;  %s355_s16 = int_to_ptr.vmem [resolvable:$true] %s354_s16 }
  0x28   :  { %v535_v5 = vpack.c.bf16 %v48_v4, %v47_v2  ;;  %v50_v7 = vld [vmem:[#allocation5 + $0x28] sm:$0xff]  ;;  %v51_v9 = vld [vmem:[#allocation5 + $0x30] sm:$0xff]  ;;  %v52_v10 = vld [vmem:[#allocation5 + $0x38] sm:$0xff]  ;;  %s676_s17 = scalar_lea.vmem %s355_s16, 256  ;;  %p681_p3 = scmp.lt.s32.totalorder %s355_s16, %s355_s16 }
  0x29   :  { %532 = vmatprep.subr.bf16.mxu0 %v531_v3  ;;  %v539_v8 = vpack.c.bf16 %v50_v7, %v49_v6  ;;  %v43_v11 = vld [vmem:[#allocation2] sm:$0xff]  ;;  %v146_v12 = vld [vmem:[#allocation5 + $0x80] sm:$0xff]  ;;  %v147_v13 = vld [vmem:[#allocation5 + $0x88] sm:$0xff]  ;;  %v543_v20 = vpack.c.bf16 %v52_v10, %v51_v9  ;;  %p677_p2 = scmp.ne.s32.totalorder %s355_s16, %s676_s17  ;;  %p682_p4 = scmp.lt.s32.totalorder %s676_s17, %s676_s17 }
  0x2a   :  { %534 = vmatpush3.bf16.msra.mxu0 %v531_v3  ;;  %458 = vmatprep.mubr.f32.mxu0 %v43_v11  ;;  %v148_v14 = vld [vmem:[#allocation5 + $0x90] sm:$0xff]  ;;  %v563_v15 = vpack.c.bf16 %v147_v13, %v146_v12  ;;  %v149_v16 = vld [vmem:[#allocation5 + $0x98] sm:$0xff]  ;;  %v150_v18 = vld [vmem:[#allocation5 + $0xa0] sm:$0xff] }
  0x2b   :  { %536 = vmatprep.subr.bf16.mxu0 %v535_v5  ;;  %v567_v17 = vpack.c.bf16 %v149_v16, %v148_v14  ;;  %v151_v19 = vld [vmem:[#allocation5 + $0xa8] sm:$0xff]  ;;  %v53_v21 = vld [vmem:[#allocation5 + $0x40] sm:$0xff]  ;;  %v152_v24 = vld [vmem:[#allocation5 + $0xb0] sm:$0xff]  ;;  %p683_p5 = por %p682_p4, %p681_p3 }
  0x2c   :  { %564 = vmatprep.subr.bf16.mxu1 %v563_v15  ;;  %v54_v22 = vld [vmem:[#allocation5 + $0x48] sm:$0xff]  ;;  %v571_v23 = vpack.c.bf16 %v151_v19, %v150_v18  ;;  %v153_v25 = vld [vmem:[#allocation5 + $0xb8] sm:$0xff]  ;;  %v55_v27 = vld [vmem:[#allocation5 + $0x50] sm:$0xff] }
  0x2d   :  { %566 = vmatpush3.bf16.msra.mxu1 %v563_v15  ;;  %v547_v26 = vpack.c.bf16 %v54_v22, %v53_v21  ;;  %v56_v28 = vld [vmem:[#allocation5 + $0x58] sm:$0xff]  ;;  %v575_v29 = vpack.c.bf16 %v153_v25, %v152_v24  ;;  %v154_v30 = vld [vmem:[#allocation5 + $0xc0] sm:$0xff]  ;;  %v155_v31 = vld [vmem:[#allocation5 + $0xc8] sm:$0xff]  ;;  %p684_p6 = pnand %p683_p5, %p677_p2 }
  0x2e   :  { %538 = vmatpush3.bf16.msra.mxu0 %v535_v5  ;;  %568 = vmatprep.subr.bf16.mxu1 %v567_v17  ;;  %v551_v32 = vpack.c.bf16 %v56_v28, %v55_v27  ;;  %v57_v33 = vld [vmem:[#allocation5 + $0x60] sm:$0xff]  ;;  %v58_v34 = vld [vmem:[#allocation5 + $0x68] sm:$0xff]  ;;  %v579_v35 = vpack.c.bf16 %v155_v31, %v154_v30  ;;  %v156_v36 = vld [vmem:[#allocation5 + $0xd0] sm:$0xff] }
  0x2f   :  { %540 = vmatprep.subr.bf16.mxu0 %v539_v8  ;;  %v157_v37 = vld [vmem:[#allocation5 + $0xd8] sm:$0xff]  ;;  %v555_v38 = vpack.c.bf16 %v58_v34, %v57_v33  ;;  %v59_v39 = vld [vmem:[#allocation5 + $0x70] sm:$0xff]  ;;  %v158_v42 = vld [vmem:[#allocation5 + $0xe0] sm:$0xff] }
  0x30   :  { %v60_v40 = vld [vmem:[#allocation5 + $0x78] sm:$0xff]  ;;  %v583_v41 = vpack.c.bf16 %v157_v37, %v156_v36  ;;  %v159_v43 = vld [vmem:[#allocation5 + $0xe8] sm:$0xff]  ;;  %v160_v47 = vld [vmem:[#allocation5 + $0xf0] sm:$0xff] }
  0x31   :  { %570 = vmatpush3.bf16.msra.mxu1 %v567_v17  ;;  %v559_v44 = vpack.c.bf16 %v60_v40, %v59_v39  ;;  %v587_v45 = vpack.c.bf16 %v159_v43, %v158_v42  ;;  %v44_v46 = vld [vmem:[#allocation2 + $0x8] sm:$0xff]  ;;  %v248_v50 = vld [vmem:[#allocation5 + $0x100] sm:$0xff]  ;;  %v249_v51 = vld [vmem:[#allocation5 + $0x108] sm:$0xff] }
  0x32   :  { %542 = vmatpush3.bf16.msra.mxu0 %v539_v8  ;;  %572 = vmatprep.subr.bf16.mxu1 %v571_v23  ;;  %v161_v48 = vld [vmem:[#allocation5 + $0xf8] sm:$0xff]  ;;  %v250_v52 = vld [vmem:[#allocation5 + $0x110] sm:$0xff]  ;;  %v595_v53 = vpack.c.bf16 %v249_v51, %v248_v50  ;;  %v252_v56 = vld [vmem:[#allocation5 + $0x120] sm:$0xff] }
  0x33   :  { %544 = vmatprep.subr.bf16.mxu0 %v543_v20  ;;  %v591_v49 = vpack.c.bf16 %v161_v48, %v160_v47  ;;  %v251_v54 = vld [vmem:[#allocation5 + $0x118] sm:$0xff]  ;;  %v253_v57 = vld [vmem:[#allocation5 + $0x128] sm:$0xff]  ;;  %v254_v59 = vld [vmem:[#allocation5 + $0x130] sm:$0xff] }
  0x34   :  { %v599_v55 = vpack.c.bf16 %v251_v54, %v250_v52  ;;  %v603_v58 = vpack.c.bf16 %v253_v57, %v252_v56  ;;  %v255_v60 = vld [vmem:[#allocation5 + $0x138] sm:$0xff]  ;;  %v256_v62 = vld [vmem:[#allocation5 + $0x140] sm:$0xff]  ;;  %v257_v63 = vld [vmem:[#allocation5 + $0x148] sm:$0xff] }
  0x35   :  { %574 = vmatpush3.bf16.msra.mxu1 %v571_v23  ;;  %v607_v61 = vpack.c.bf16 %v255_v60, %v254_v59  ;;  %v611_v0 = vpack.c.bf16 %v257_v63, %v256_v62  ;;  %v258_v1 = vld [vmem:[#allocation5 + $0x150] sm:$0xff]  ;;  %v259_v2 = vld [vmem:[#allocation5 + $0x158] sm:$0xff]  ;;  %v260_v4 = vld [vmem:[#allocation5 + $0x160] sm:$0xff] }
  0x36   :  { %546 = vmatpush3.bf16.msra.mxu0 %v543_v20  ;;  %576 = vmatprep.subr.bf16.mxu1 %v575_v29  ;;  %v615_v3 = vpack.c.bf16 %v259_v2, %v258_v1  ;;  %v261_v5 = vld [vmem:[#allocation5 + $0x168] sm:$0xff]  ;;  %v367_v7 = vld [vmem:[%s785_s2] ss:$0 sm:$0xff]  ;;  %v263_v15 = vld [vmem:[#allocation5 + $0x178] sm:$0xff] }
  0x37   :  { %548 = vmatprep.subr.bf16.mxu0 %v547_v26  ;;  %v619_v6 = vpack.c.bf16 %v261_v5, %v260_v4  ;;  %v262_v14 = vld [vmem:[#allocation5 + $0x170] sm:$0xff] }
  0x38   :  { %v623_v16 = vpack.c.bf16 %v263_v15, %v262_v14  ;;  %v369_v17 = vld [vmem:[%s785_s2 + $0x1] ss:$0 sm:$0xff]  ;;  %v371_v24 = vld [vmem:[%s785_s2 + $0x2] ss:$0 sm:$0xff] }
  0x39   :  { %578 = vmatpush3.bf16.msra.mxu1 %v575_v29 }
  0x3a   :  { %550 = vmatpush3.bf16.msra.mxu0 %v547_v26  ;;  %580 = vmatprep.subr.bf16.mxu1 %v579_v35 }
  0x3b   :  { %552 = vmatprep.subr.bf16.mxu0 %v551_v32 }
  0x3d   :  { %582 = vmatpush3.bf16.msra.mxu1 %v579_v35 }
  0x3e   :  { %554 = vmatpush3.bf16.msra.mxu0 %v551_v32  ;;  %584 = vmatprep.subr.bf16.mxu1 %v583_v41 }
  0x3f   :  { %556 = vmatprep.subr.bf16.mxu0 %v555_v38 }
  0x41   :  { %586 = vmatpush3.bf16.msra.mxu1 %v583_v41 }
  0x42   :  { %558 = vmatpush3.bf16.msra.mxu0 %v555_v38  ;;  %588 = vmatprep.subr.bf16.mxu1 %v587_v45 }
  0x43   :  { %560 = vmatprep.subr.bf16.mxu0 %v559_v44 }
  0x45   :  { %590 = vmatpush3.bf16.msra.mxu1 %v587_v45 }
  0x46   :  { %562 = vmatpush3.bf16.msra.mxu0 %v559_v44  ;;  %592 = vmatprep.subr.bf16.mxu1 %v591_v49 }
  0x47   :  { %596 = vmatprep.subr.bf16.mxu0 %v595_v53 }
  0x49   :  { %459 = vmatmul.mubr.f32.vlgmr.msra.gmra.mrb[0].mxu0 %v44_v46  ;;  %594 = vmatpush3.bf16.msra.mxu1 %v591_v49 }
  0x4a   :  { %598 = vmatpush3.bf16.msra.mxu0 %v595_v53 }
  0x4b   :  { %600 = vmatprep.subr.bf16.mxu0 %v599_v55 }
  0x4e   :  { %602 = vmatpush3.bf16.msra.mxu0 %v599_v55 }
  0x4f   :  { %604 = vmatprep.subr.bf16.mxu0 %v603_v58 }
  0x52   :  { %606 = vmatpush3.bf16.msra.mxu0 %v603_v58 }
  0x53   :  { %608 = vmatprep.subr.bf16.mxu0 %v607_v61 }
  0x56   :  { %610 = vmatpush3.bf16.msra.mxu0 %v607_v61 }
  0x57   :  { %612 = vmatprep.subr.bf16.mxu0 %v611_v0 }
  0x5a   :  { %614 = vmatpush3.bf16.msra.mxu0 %v611_v0 }
  0x5b   :  { %616 = vmatprep.subr.bf16.mxu0 %v615_v3 }
  0x5e   :  { %618 = vmatpush3.bf16.msra.mxu0 %v615_v3 }
  0x5f   :  { %620 = vmatprep.subr.bf16.mxu0 %v619_v6 }
  0x62   :  { %622 = vmatpush3.bf16.msra.mxu0 %v619_v6 }
  0x63   :  { %624 = vmatprep.subr.bf16.mxu0 %v623_v16 }
  0x66   :  { %626 = vmatpush3.bf16.msra.mxu0 %v623_v16 }
 0x11c   :  { %v460_v8 = vpop.f32.mrb[0].mxu0 }
 0x11d   :  { %v140_v9 = vadd.f32 %v460_v8, %v367_v7  ;;  %v134_v10 = vpop.f32.mrb[1].mxu0 }
 0x11e   :  { %v135_v11 = vadd.f32 %v367_v7, %v134_v10 }
 0x11f   :  { %v144_v13 = vmax.f32 %v140_v9, 0.0 }
 0x120   :  { %v143_v12 = vmax.f32 %v135_v11, 0.0 }
 0x122   :  { %493 = vmatprep.mubr.f32.mxu1 %v143_v12 }
 0x123   :  { %494 = vmatmul.mubr.f32.vlgmr.msra.gmra.mrb[0].mxu1 %v144_v13 }
 0x1f6   :  { %v495_v18 = vpop.f32.mrb[0].mxu1 }
 0x1f7   :  { %v242_v19 = vadd.f32 %v495_v18, %v369_v17  ;;  %v236_v20 = vpop.f32.mrb[1].mxu1 }
 0x1f8   :  { %v237_v21 = vadd.f32 %v369_v17, %v236_v20 }
 0x1f9   :  { %v246_v23 = vmax.f32 %v242_v19, 0.0 }
 0x1fa   :  { %v245_v22 = vmax.f32 %v237_v21, 0.0 }
 0x1fc   :  { %528 = vmatprep.mubr.f32.mxu0 %v245_v22 }
 0x1fd   :  { %529 = vmatmul.mubr.f32.vlgmr.msra.gmra.mrb[2].mxu0 %v246_v23 }
 0x2d0   :  { %v530_v25 = vpop.f32.mrb[2].mxu0 }
 0x2d1   :  { %v344_v26 = vadd.f32 %v530_v25, %v371_v24  ;;  %v338_v27 = vpop.f32.mrb[3].mxu0 }
 0x2d2   :  { %v339_v28 = vadd.f32 %v371_v24, %v338_v27 }
 0x2d3   :  { %348 = vst [vmem:[#allocation7 + $0x8] sm:$0xff] %v344_v26 }
 0x2d4   :  { %347 = vst [vmem:[#allocation7] sm:$0xff] %v339_v28 }
 0x2d5   :  { %687 = shalt.err (!%p684_p6)
}
 0x2d6   :  { %s688_s2 = scalar_lea.hbm %s786_s3, 256 }
 0x2d7   :  { %p689_p7 = scmp.ne.s32.totalorder %s786_s3, %s688_s2  ;;  %p692_p8 = scmp.lt.u32.totalorder %s688_s2, %s786_s3 }
 0x2d9   :  { %p694_p9 = pnand %p692_p8, %p689_p7 }
 0x2db   :  { %697 = shalt.err (!%p694_p9)
}
 0x2dc   :  { %360 = dma.vmem_to_hbm [thread:$0]  %s355_s16, 256, %s786_s3, [#allocation4], %s705_s22, %s705_s22, %s706_s23  }
 0x2dd   :  { %702 = dma.done.wait [#allocation4], 256  }
 0x2de   :  { %703 = vsyncadd [#allocation4], 4294967040 }
 0x2df   :  { %364 = vsyncpa [#allocation3], 1 }
 0x2e0   :  { %365 = vsyncpa [#allocation6], 1 }
 0x2e1   :  { %366 = vsyncpa [#allocation4], 1 }

</bundles_post_ra>
